<compile_context>
chip_gen: v6e
topology: v6e:2x2x1
jax: 0.10.0
libtpu: 0.0.40
codegen_flags: <defaults>
</compile_context>

<pallas_src>
import jax
import jax.numpy as jnp
from jax.experimental import pallas as pl
from jax.experimental.pallas import tpu as pltpu


def _make_hbm_copy_kernel(n_chunks, chunk_rows):
    """HBM->HBM copy: issue n_chunks DMAs over the leading axis, then wait."""

    def kernel(x_hbm, o_hbm, sem):
        if n_chunks == 1:
            cp = pltpu.make_async_copy(x_hbm, o_hbm, sem.at[0])
            cp.start()
            cp.wait()
            return
        copies = []
        for c in range(n_chunks):
            sl = pl.ds(c * chunk_rows, chunk_rows)
            cp = pltpu.make_async_copy(x_hbm.at[sl], o_hbm.at[sl], sem.at[c])
            cp.start()
            copies.append(cp)
        for cp in copies:
            cp.wait()

    return kernel


def _pick_n_chunks(leading_dim, max_chunks=4):
    """Largest chunk count (<= max_chunks) such that each chunk keeps the
    leading dim a multiple of 8 (sublane tile); otherwise a single DMA."""
    n = max_chunks
    while n > 1:
        if leading_dim % (8 * n) == 0:
            return n
        n //= 2
    return 1


@jax.jit
def _materialized_copy(x):
    """Copy x into a fresh HBM buffer via direct HBM->HBM DMA.

    No VMEM staging, no grid, no aliasing — a single pallas_call whose refs
    live in pl.ANY (HBM) and whose body only issues async copies.
    """
    leading = x.shape[0] if x.ndim >= 1 else 1
    n_chunks = _pick_n_chunks(leading) if x.ndim >= 2 else 1
    chunk_rows = leading // n_chunks
    return pl.pallas_call(
        _make_hbm_copy_kernel(n_chunks, chunk_rows),
        out_shape=jax.ShapeDtypeStruct(x.shape, x.dtype),
        in_specs=[pl.BlockSpec(memory_space=pl.ANY)],
        out_specs=pl.BlockSpec(memory_space=pl.ANY),
        scratch_shapes=[pltpu.SemaphoreType.DMA((n_chunks,))],
    )(x)


def lambda_forward(x, func, *, force_copy=False):
    """Pallas equivalent of Lambda(func).forward(x).

    Default path: `func` in the walkthrough is a pure view/reshape, so the
    forward is zero device work — just return func(x) (no HBM traffic, no
    kernel launch).

    force_copy=True: first materialize an independent copy of x in a fresh
    HBM buffer with a (chunked) HBM->HBM DMA, then apply func.
    """
    if not force_copy:
        return func(x)
    return func(_materialized_copy(x))


if __name__ == "__main__":
    # Small shapes consistent with the walkthrough's preprocess lambda:
    # flattened (B, H*W) images -> NCHW (B, 1, H, W).  H = W = 16 here.
    B, H, W = 16, 16, 16
    key = jax.random.PRNGKey(0)
    x = jax.random.normal(key, (B, H * W), dtype=jnp.float32)

    # The function wrapped by Lambda (PyTorch: lambda x: x.view(-1, 1, 28, 28)).
    preprocess = lambda t: jnp.reshape(t, (-1, 1, H, W))

    # Reference: plain JAX application of the same func.
    ref = jax.block_until_ready(preprocess(x))

    # Default (recommended) path: zero-cost view, no kernel, no HBM traffic.
    out_fast = jax.block_until_ready(lambda_forward(x, preprocess))

    # Materialized path: jitted HBM->HBM DMA copy (here 2 chunks of 8 rows),
    # landing in a fresh buffer independent of x.
    out_kernel = jax.block_until_ready(
        lambda_forward(x, preprocess, force_copy=True)
    )

    assert out_fast.shape == (B, 1, H, W), out_fast.shape
    assert out_kernel.shape == (B, 1, H, W), out_kernel.shape
    assert out_kernel.dtype == x.dtype
    assert jnp.array_equal(out_fast, ref)
    assert jnp.array_equal(out_kernel, ref)

    print("KERNEL_OK")
</pallas_src>

<mosaic_0001>
module attributes {stable_mosaic.version = 11 : i64} {
  func.func @kernel(%arg0: memref<16x256xf32, #tpu.memory_space<any>>, %arg1: memref<16x256xf32, #tpu.memory_space<any>>, %arg2: memref<2x!tpu.dma_semaphore, #tpu.memory_space<semaphore_mem>>) attributes {dimension_semantics = [], scalar_prefetch = 0 : i64, scratch_operands = 1 : i64, tpu.core_type = #tpu.core_type<tc>} {
    %c0_i32 = arith.constant 0 : i32
    %c0_i32_0 = arith.constant 0 : i32
    %c0_i32_1 = arith.constant 0 : i32
    %0 = tpu.memref_slice %arg0[%c0_i32_0, %c0_i32_1] : memref<16x256xf32, #tpu.memory_space<any>> -> memref<8x256xf32, #tpu.memory_space<any>>
    %c0_i32_2 = arith.constant 0 : i32
    %c0_i32_3 = arith.constant 0 : i32
    %1 = tpu.memref_slice %arg1[%c0_i32_2, %c0_i32_3] : memref<16x256xf32, #tpu.memory_space<any>> -> memref<8x256xf32, #tpu.memory_space<any>>
    %2 = tpu.memref_slice %arg2[%c0_i32] : memref<2x!tpu.dma_semaphore, #tpu.memory_space<semaphore_mem>> -> memref<1x!tpu.dma_semaphore, #tpu.memory_space<semaphore_mem>>
    %3 = tpu.memref_squeeze %2 : memref<1x!tpu.dma_semaphore, #tpu.memory_space<semaphore_mem>> -> memref<!tpu.dma_semaphore, #tpu.memory_space<semaphore_mem>>
    tpu.enqueue_dma source(%0 : memref<8x256xf32, #tpu.memory_space<any>>) target(%1 : memref<8x256xf32, #tpu.memory_space<any>>) target_semaphore(%3 : memref<!tpu.dma_semaphore, #tpu.memory_space<semaphore_mem>>)
    %c1_i32 = arith.constant 1 : i32
    %c8_i32 = arith.constant 8 : i32
    %c0_i32_4 = arith.constant 0 : i32
    %4 = tpu.memref_slice %arg0[%c8_i32, %c0_i32_4] : memref<16x256xf32, #tpu.memory_space<any>> -> memref<8x256xf32, #tpu.memory_space<any>>
    %c8_i32_5 = arith.constant 8 : i32
    %c0_i32_6 = arith.constant 0 : i32
    %5 = tpu.memref_slice %arg1[%c8_i32_5, %c0_i32_6] : memref<16x256xf32, #tpu.memory_space<any>> -> memref<8x256xf32, #tpu.memory_space<any>>
    %6 = tpu.memref_slice %arg2[%c1_i32] : memref<2x!tpu.dma_semaphore, #tpu.memory_space<semaphore_mem>> -> memref<1x!tpu.dma_semaphore, #tpu.memory_space<semaphore_mem>>
    %7 = tpu.memref_squeeze %6 : memref<1x!tpu.dma_semaphore, #tpu.memory_space<semaphore_mem>> -> memref<!tpu.dma_semaphore, #tpu.memory_space<semaphore_mem>>
    tpu.enqueue_dma source(%4 : memref<8x256xf32, #tpu.memory_space<any>>) target(%5 : memref<8x256xf32, #tpu.memory_space<any>>) target_semaphore(%7 : memref<!tpu.dma_semaphore, #tpu.memory_space<semaphore_mem>>)
    %c0_i32_7 = arith.constant 0 : i32
    %c0_i32_8 = arith.constant 0 : i32
    %c0_i32_9 = arith.constant 0 : i32
    %8 = tpu.memref_slice %arg0[%c0_i32_8, %c0_i32_9] : memref<16x256xf32, #tpu.memory_space<any>> -> memref<8x256xf32, #tpu.memory_space<any>>
    %c0_i32_10 = arith.constant 0 : i32
    %c0_i32_11 = arith.constant 0 : i32
    %9 = tpu.memref_slice %arg1[%c0_i32_10, %c0_i32_11] : memref<16x256xf32, #tpu.memory_space<any>> -> memref<8x256xf32, #tpu.memory_space<any>>
    %10 = tpu.memref_slice %arg2[%c0_i32_7] : memref<2x!tpu.dma_semaphore, #tpu.memory_space<semaphore_mem>> -> memref<1x!tpu.dma_semaphore, #tpu.memory_space<semaphore_mem>>
    %11 = tpu.memref_squeeze %10 : memref<1x!tpu.dma_semaphore, #tpu.memory_space<semaphore_mem>> -> memref<!tpu.dma_semaphore, #tpu.memory_space<semaphore_mem>>
    tpu.wait_dma2 semaphore(%11 : memref<!tpu.dma_semaphore, #tpu.memory_space<semaphore_mem>>) src(%8 : memref<8x256xf32, #tpu.memory_space<any>>) dst(%9 : memref<8x256xf32, #tpu.memory_space<any>>)
    %c1_i32_12 = arith.constant 1 : i32
    %c8_i32_13 = arith.constant 8 : i32
    %c0_i32_14 = arith.constant 0 : i32
    %12 = tpu.memref_slice %arg0[%c8_i32_13, %c0_i32_14] : memref<16x256xf32, #tpu.memory_space<any>> -> memref<8x256xf32, #tpu.memory_space<any>>
    %c8_i32_15 = arith.constant 8 : i32
    %c0_i32_16 = arith.constant 0 : i32
    %13 = tpu.memref_slice %arg1[%c8_i32_15, %c0_i32_16] : memref<16x256xf32, #tpu.memory_space<any>> -> memref<8x256xf32, #tpu.memory_space<any>>
    %14 = tpu.memref_slice %arg2[%c1_i32_12] : memref<2x!tpu.dma_semaphore, #tpu.memory_space<semaphore_mem>> -> memref<1x!tpu.dma_semaphore, #tpu.memory_space<semaphore_mem>>
    %15 = tpu.memref_squeeze %14 : memref<1x!tpu.dma_semaphore, #tpu.memory_space<semaphore_mem>> -> memref<!tpu.dma_semaphore, #tpu.memory_space<semaphore_mem>>
    tpu.wait_dma2 semaphore(%15 : memref<!tpu.dma_semaphore, #tpu.memory_space<semaphore_mem>>) src(%12 : memref<8x256xf32, #tpu.memory_space<any>>) dst(%13 : memref<8x256xf32, #tpu.memory_space<any>>)
    return
  }
}

</mosaic_0001>

<bundles_post_ra>
// kernel: _materialized_copy.1
= control target key start
LH: loop header
LB: loop body
LE: loop exit
PB: predicated region body
PF: predicated region fallthrough
CT: control target
= control target key end

     0   :  { %s52_s9 = smov [#allocation2]   ;;  %s53_s10 = smov 131072   ;;  %s78_s0 = inlined_call_operand.hbm [shape: f32[16,256], index: 0, kind: input, shape index: {}]   ;;  %s79_s1 = inlined_call_operand.hbm [shape: f32[16,256], index: 1, kind: output, shape index: {}]  }
   0x1   :  { %s13_s8 = scalar_lea.hbm %s78_s0, 256  ;;  %s54_s11 = smov 0  }
   0x2   :  { %12 = dma.general %s78_s0, 256, %s79_s1, %s52_s9, %s53_s10, [#allocation4], %s54_s11, 0  }
   0x3   :  { %s14_s18 = scalar_lea.hbm %s79_s1, 256  ;;  %s55_s19 = smov [#allocation2 + $0x1]  }
   0x4   :  { %22 = dma.general %s13_s8, 256, %s14_s18, %s55_s19, %s53_s10, [#allocation6], %s54_s11, 0  }
   0x5   :  { %48 = dma.done.wait [#allocation2], 256 }
   0x6   :  { %49 = vsyncadd [#allocation2], 4294967040 }
   0x7   :  { %50 = dma.done.wait [#allocation2 + $0x1], 256 }
   0x8   :  { %51 = vsyncadd [#allocation2 + $0x1], 4294967040 }
   0x9   :  { %29 = vsyncmov [#allocation2] }
   0xc   :  { %s30_s20 = vpop.sfrf %29 }
   0xd   :  { %p42_p0 = scmp.ne.s32.totalorder %s30_s20, 0 }
   0xf   :  { %34 = shalt.err (%p42_p0)  }
  0x10   :  { %36 = vsyncmov [#allocation2 + $0x1] }
  0x13   :  { %s37_s21 = vpop.sfrf %36 }
  0x14   :  { %p43_p1 = scmp.ne.s32.totalorder %s37_s21, 0 }
  0x16   :  { %41 = shalt.err (%p43_p1)  }

</bundles_post_ra>
